<compile_context>
chip_gen: v5e
topology: v5e:2x2
jax: 0.10.0
libtpu: 0.0.40
codegen_flags: <defaults>
</compile_context>

<pallas_src>
import functools
import math

import numpy as np
import jax
import jax.numpy as jnp
from jax import lax
from jax.experimental import pallas as pl
from jax.experimental.pallas import tpu as pltpu


def _cdiv(a, b):
    return -(-a // b)


def _ceil_to(a, m):
    return _cdiv(a, m) * m


def _vmem_limit(ws_bytes):
    lim = int(ws_bytes * 1.25) + (2 << 20)
    return max(16 << 20, min(32 << 20, lim))


def _apply_epilogue(acc, b, *, scale, lr_mul, activation, has_bias):
    """scale + bias + activation on an f32 tile (compile-time constants)."""
    out = acc * scale
    if has_bias:
        out = out + b.astype(jnp.float32) * lr_mul
    if activation in ("fused_lrelu", "lrelu"):
        out = jnp.where(out >= 0.0, out, 0.2 * out)
        if activation == "fused_lrelu":
            out = out * math.sqrt(2.0)          # fused_leaky_relu gain
    elif activation == "relu":
        out = jnp.maximum(out, 0.0)
    elif activation == "selu":
        alpha = 1.6732632423543772
        lam = 1.0507009873554805
        out = lam * jnp.where(out > 0.0, out,
                              alpha * (jnp.exp(jnp.minimum(out, 0.0)) - 1.0))
    elif activation == "tanh":
        out = jnp.tanh(out)
    return out


def _el_kernel_single(*refs, scale, lr_mul, activation, has_bias, mxu_dtype):
    """Weight-resident path: full K in one step, no accumulator scratch."""
    if has_bias:
        x_ref, w_ref, b_ref, o_ref = refs
    else:
        x_ref, w_ref, o_ref = refs
        b_ref = None
    x = x_ref[...]
    w = w_ref[...]
    if mxu_dtype is not None:
        x = x.astype(mxu_dtype)
        w = w.astype(mxu_dtype)
    acc = lax.dot_general(x, w,
                          dimension_numbers=(((1,), (0,)), ((), ())),
                          preferred_element_type=jnp.float32)
    b = b_ref[...] if has_bias else None
    out = _apply_epilogue(acc, b, scale=scale, lr_mul=lr_mul,
                          activation=activation, has_bias=has_bias)
    o_ref[...] = out.astype(o_ref.dtype)


def _el_kernel_tiled(*refs, scale, lr_mul, activation, has_bias, mxu_dtype):
    """Tiled fallback: K-innermost reduction with an f32 VMEM accumulator."""
    if has_bias:
        x_ref, w_ref, b_ref, o_ref, acc_ref = refs
    else:
        x_ref, w_ref, o_ref, acc_ref = refs
        b_ref = None
    k = pl.program_id(2)

    @pl.when(k == 0)
    def _():
        acc_ref[...] = jnp.zeros_like(acc_ref)

    x = x_ref[...]
    w = w_ref[...]
    if mxu_dtype is not None:
        x = x.astype(mxu_dtype)
        w = w.astype(mxu_dtype)
    acc_ref[...] += lax.dot_general(x, w,
                                    dimension_numbers=(((1,), (0,)), ((), ())),
                                    preferred_element_type=jnp.float32)

    @pl.when(k == pl.num_programs(2) - 1)
    def _():
        b = b_ref[...] if has_bias else None
        out = _apply_epilogue(acc_ref[...], b, scale=scale, lr_mul=lr_mul,
                              activation=activation, has_bias=has_bias)
        o_ref[...] = out.astype(o_ref.dtype)


def equal_linear_pallas(x, weight, bias=None, lr_mul=1.0, activation=None,
                        block_m=512, block_n=512, block_k=512,
                        mxu_dtype=None,
                        resident_vmem_budget=20 * 1024 * 1024):
    """Pallas equivalent of EqualLinear(in_dim, out_dim, ...).forward(x)."""
    out_dim, in_dim = weight.shape
    assert x.shape[-1] == in_dim
    scale = 1.0 / math.sqrt(in_dim) * lr_mul

    lead = x.shape[:-1]
    M = int(np.prod(lead)) if lead else 1
    x2 = x.reshape(M, in_dim)

    # One-time tiny transpose: the kernel contracts the RHS *first* dim, so no
    # per-tile transposes compete with vmatmul for the vector-extended slots.
    w_t = weight.T                                        # (in_dim, out_dim)

    has_bias = bias is not None
    b2 = bias.reshape(1, out_dim) if has_bias else None

    xb = jnp.dtype(x.dtype).itemsize
    wb = jnp.dtype(weight.dtype).itemsize
    sub = 16 if xb < 4 else 8          # min sublane tile (bf16 needs 16)

    kernel_kw = dict(scale=float(scale), lr_mul=float(lr_mul),
                     activation=activation, has_bias=has_bias,
                     mxu_dtype=mxu_dtype)

    # ---------------- weight-resident fast path ----------------
    tm = M if M <= block_m else block_m

    def _ws_res(tm_):
        return (2 * tm_ * in_dim * xb        # x blocks (double-buffered)
                + 2 * tm_ * out_dim * xb     # out blocks
                + 2 * in_dim * out_dim * wb  # resident W^T (conservative x2)
                + 2 * out_dim * wb)          # bias

    if _ws_res(tm) > resident_vmem_budget and M > 128:
        for tm_try in (256, 128):            # shrink M tile before giving up
            if tm_try < tm and _ws_res(tm_try) <= resident_vmem_budget:
                tm = tm_try
                break
    ws_resident = _ws_res(tm)

    if ws_resident <= resident_vmem_budget:
        grid_m = _cdiv(M, tm)
        # v7x has 2 TensorCores sharing the "parallel" axis: keep >= 2 blocks
        # whenever there is enough work to split.
        if grid_m == 1 and M >= 4 * sub:
            tm = _ceil_to(_cdiv(M, 2), sub)
            grid_m = _cdiv(M, tm)

        in_specs = [pl.BlockSpec((tm, in_dim), lambda i: (i, 0)),      # x
                    pl.BlockSpec((in_dim, out_dim), lambda i: (0, 0))]  # W^T
        args = [x2, w_t]
        if has_bias:
            in_specs.append(pl.BlockSpec((1, out_dim), lambda i: (0, 0)))
            args.append(b2)

        out = pl.pallas_call(
            functools.partial(_el_kernel_single, **kernel_kw),
            out_shape=jax.ShapeDtypeStruct((M, out_dim), x.dtype),
            grid=(grid_m,),
            in_specs=in_specs,
            out_specs=pl.BlockSpec((tm, out_dim), lambda i: (i, 0)),
            compiler_params=pltpu.CompilerParams(
                dimension_semantics=("parallel",),
                vmem_limit_bytes=_vmem_limit(ws_resident)),
        )(*args)
        return out.reshape(lead + (out_dim,))

    # ---------------- tiled fallback (huge weights) ----------------
    tm = M if M <= block_m else block_m
    tn = out_dim if out_dim <= block_n else block_n
    tk = in_dim if in_dim <= block_k else block_k
    if tm != M:
        assert tm % sub == 0, "block_m must be a multiple of the sublane tile"
    if tn != out_dim:
        assert tn % 128 == 0, "block_n must be a multiple of 128"
    if tk != in_dim:
        assert tk % 128 == 0, "block_k must be a multiple of 128"

    # Only the K (reduction) tail needs zero padding; ragged M / N edge blocks
    # are handled by Pallas' masked output stores.
    Kp = _ceil_to(in_dim, tk)
    if Kp != in_dim:
        x2 = jnp.pad(x2, ((0, 0), (0, Kp - in_dim)))
        w_t = jnp.pad(w_t, ((0, Kp - in_dim), (0, 0)))
    grid = (_cdiv(M, tm), _cdiv(out_dim, tn), Kp // tk)

    in_specs = [pl.BlockSpec((tm, tk), lambda i, j, k: (i, k)),   # x
                pl.BlockSpec((tk, tn), lambda i, j, k: (k, j))]   # W^T
    args = [x2, w_t]
    if has_bias:
        in_specs.append(pl.BlockSpec((1, tn), lambda i, j, k: (0, j)))
        args.append(b2)

    ws_tiled = (2 * tm * tk * xb + 2 * tk * tn * wb + 2 * tm * tn * xb
                + tm * tn * 4 + 2 * tn * wb)

    out = pl.pallas_call(
        functools.partial(_el_kernel_tiled, **kernel_kw),
        out_shape=jax.ShapeDtypeStruct((M, out_dim), x.dtype),
        grid=grid,
        in_specs=in_specs,
        out_specs=pl.BlockSpec((tm, tn), lambda i, j, k: (i, j)),
        scratch_shapes=[pltpu.VMEM((tm, tn), jnp.float32)],
        compiler_params=pltpu.CompilerParams(
            dimension_semantics=("parallel", "parallel", "arbitrary"),
            vmem_limit_bytes=_vmem_limit(ws_tiled)),
    )(*args)
    return out.reshape(lead + (out_dim,))


def equal_linear_reference(x, weight, bias=None, lr_mul=1.0, activation=None):
    """Pure-JAX reference matching the PyTorch forward."""
    out_dim, in_dim = weight.shape
    scale = 1.0 / math.sqrt(in_dim) * lr_mul
    out = jnp.matmul(x.astype(jnp.float32),
                     (weight.astype(jnp.float32) * scale).T)
    if bias is not None:
        out = out + bias.astype(jnp.float32) * lr_mul
    if activation in ("fused_lrelu", "lrelu"):
        out = jnp.where(out >= 0.0, out, 0.2 * out)
        if activation == "fused_lrelu":
            out = out * math.sqrt(2.0)
    elif activation == "relu":
        out = jnp.maximum(out, 0.0)
    elif activation == "selu":
        out = jax.nn.selu(out)
    elif activation == "tanh":
        out = jnp.tanh(out)
    return out.astype(x.dtype)


def _check(y, y_ref, rtol, atol):
    np.testing.assert_allclose(np.asarray(y.astype(jnp.float32)),
                               np.asarray(y_ref.astype(jnp.float32)),
                               rtol=rtol, atol=atol)


if __name__ == "__main__":
    key = jax.random.PRNGKey(0)
    kx, kw, kb, kx2, kw2, kb2, kx3, kw3, kb3 = jax.random.split(key, 9)

    # --- small StyleGAN-mapping-style config (weight-resident path) ---
    batch, seq, in_dim, out_dim = 2, 8, 32, 48
    lr_mul = 0.01
    x = jax.random.normal(kx, (batch, seq, in_dim), dtype=jnp.float32)
    weight = jax.random.normal(kw, (out_dim, in_dim), dtype=jnp.float32) / lr_mul
    bias = 0.1 * jax.random.normal(kb, (out_dim,), dtype=jnp.float32)

    for act in (None, "fused_lrelu", "lrelu", "relu", "tanh", "selu"):
        y = jax.block_until_ready(
            equal_linear_pallas(x, weight, bias, lr_mul=lr_mul, activation=act))
        y_ref = equal_linear_reference(x, weight, bias, lr_mul=lr_mul,
                                       activation=act)
        assert y.shape == (batch, seq, out_dim), y.shape
        _check(y, y_ref, 2e-2, 2e-2)

    # bias=False path (no bias block is passed to the kernel at all)
    y = jax.block_until_ready(
        equal_linear_pallas(x, weight, None, lr_mul=lr_mul, activation=None))
    _check(y, equal_linear_reference(x, weight, None, lr_mul=lr_mul), 2e-2, 2e-2)

    # --- medium config: exercises the v7x >=2-parallel-block split ---
    xm = jax.random.normal(kx2, (4, 64, 64), dtype=jnp.float32)
    wm = jax.random.normal(kw2, (96, 64), dtype=jnp.float32)
    bm = 0.1 * jax.random.normal(kb2, (96,), dtype=jnp.float32)
    y = jax.block_until_ready(
        equal_linear_pallas(xm, wm, bm, lr_mul=1.0, activation="lrelu"))
    _check(y, equal_linear_reference(xm, wm, bm, 1.0, "lrelu"), 2e-2, 2e-2)

    # --- tiled fallback path (forced): ragged M/N edges + K-tail padding ---
    xt = jax.random.normal(kx3, (5, 8, 200), dtype=jnp.float32)
    wt = jax.random.normal(kw3, (192, 200), dtype=jnp.float32)
    bt = 0.1 * jax.random.normal(kb3, (192,), dtype=jnp.float32)
    y = jax.block_until_ready(
        equal_linear_pallas(xt, wt, bt, lr_mul=1.0, activation="fused_lrelu",
                            block_m=16, block_n=128, block_k=128,
                            resident_vmem_budget=0))
    _check(y, equal_linear_reference(xt, wt, bt, 1.0, "fused_lrelu"), 2e-2, 2e-2)

    # --- bf16 inputs + bf16 MXU operands (fast path; f32 accumulate) ---
    xb16 = x.astype(jnp.bfloat16)
    wb16 = (jax.random.normal(kw, (out_dim, in_dim), dtype=jnp.float32)
            ).astype(jnp.bfloat16)
    bb16 = bias.astype(jnp.bfloat16)
    y = jax.block_until_ready(
        equal_linear_pallas(xb16, wb16, bb16, lr_mul=1.0,
                            activation="fused_lrelu",
                            mxu_dtype=jnp.bfloat16))
    y_ref = equal_linear_reference(xb16, wb16, bb16, 1.0, "fused_lrelu")
    _check(y, y_ref, 1e-1, 1e-1)

    print("KERNEL_OK")
</pallas_src>

<mosaic_0001>
module attributes {stable_mosaic.version = 11 : i64} {
  func.func @_el_kernel_single(%arg0: i32, %arg1: memref<16x32xf32, #tpu.memory_space<vmem>>, %arg2: memref<32x48xf32, #tpu.memory_space<vmem>>, %arg3: memref<1x48xf32, #tpu.memory_space<vmem>>, %arg4: memref<16x48xf32, #tpu.memory_space<vmem>>) attributes {dimension_semantics = [#tpu.dimension_semantics<parallel>], iteration_bounds = array<i64: 1>, scalar_prefetch = 0 : i64, scratch_operands = 0 : i64, tpu.core_type = #tpu.core_type<tc>, window_params = [{transform_indices = @transform_0, window_bounds = array<i64: 16, 32>}, {pipeline_mode = #tpu.pipeline_mode<synchronous>, transform_indices = @transform_1, window_bounds = array<i64: 32, 48>}, {pipeline_mode = #tpu.pipeline_mode<synchronous>, transform_indices = @transform_2, window_bounds = array<i64: 1, 48>}, {transform_indices = @transform_3, window_bounds = array<i64: 16, 48>}]} {
    %c0 = arith.constant 0 : index
    %c0_0 = arith.constant 0 : index
    %0 = vector.load %arg1[%c0, %c0_0] : memref<16x32xf32, #tpu.memory_space<vmem>>, vector<16x32xf32>
    %c0_1 = arith.constant 0 : index
    %c0_2 = arith.constant 0 : index
    %1 = vector.load %arg2[%c0_1, %c0_2] : memref<32x48xf32, #tpu.memory_space<vmem>>, vector<32x48xf32>
    %cst = arith.constant dense<0.000000e+00> : vector<16x48xf32>
    %2 = tpu.matmul %0, %1, %cst {dimension_numbers = #tpu.dot_dimension_numbers<[1], [0], [0], [1], [0, 0, 1, 1], [], []>} : vector<16x32xf32>, vector<32x48xf32>, vector<16x48xf32> -> vector<16x48xf32>
    %c0_3 = arith.constant 0 : index
    %c0_4 = arith.constant 0 : index
    %3 = vector.load %arg3[%c0_3, %c0_4] : memref<1x48xf32, #tpu.memory_space<vmem>>, vector<1x48xf32>
    %cst_5 = arith.constant 0.00176776689 : f32
    %4 = vector.broadcast %cst_5 : f32 to vector<16x48xf32>
    %5 = arith.mulf %2, %4 : vector<16x48xf32>
    %cst_6 = arith.constant 0.00999999977 : f32
    %6 = vector.broadcast %cst_6 : f32 to vector<1x48xf32>
    %7 = arith.mulf %3, %6 : vector<1x48xf32>
    %8 = vector.broadcast %7 : vector<1x48xf32> to vector<16x48xf32>
    %9 = arith.addf %5, %8 : vector<16x48xf32>
    %c0_7 = arith.constant 0 : index
    %c0_8 = arith.constant 0 : index
    %10 = vector.load %arg4[%c0_7, %c0_8] : memref<16x48xf32, #tpu.memory_space<vmem>>, vector<16x48xf32>
    tpu.vector_store %arg4[%c0_7, %c0_8], %9 {strides = array<i32>} : memref<16x48xf32, #tpu.memory_space<vmem>>, vector<16x48xf32>,
    return
  }
  func.func @transform_0(%arg0: i32) -> (i32, i32) {
    %c0_i32 = arith.constant 0 : i32
    %c0_i32_0 = arith.constant 0 : i32
    return %arg0, %c0_i32 : i32, i32
  }
  func.func @transform_1(%arg0: i32) -> (i32, i32) {
    %c0_i32 = arith.constant 0 : i32
    %c0_i32_0 = arith.constant 0 : i32
    %c0_i32_1 = arith.constant 0 : i32
    return %c0_i32, %c0_i32_0 : i32, i32
  }
  func.func @transform_2(%arg0: i32) -> (i32, i32) {
    %c0_i32 = arith.constant 0 : i32
    %c0_i32_0 = arith.constant 0 : i32
    %c0_i32_1 = arith.constant 0 : i32
    return %c0_i32, %c0_i32_0 : i32, i32
  }
  func.func @transform_3(%arg0: i32) -> (i32, i32) {
    %c0_i32 = arith.constant 0 : i32
    %c0_i32_0 = arith.constant 0 : i32
    return %arg0, %c0_i32 : i32, i32
  }
}

</mosaic_0001>

<bundles_post_ra>
// kernel: tpu_custom_call.1
= control target key start
LH: loop header
LB: loop body
LE: loop exit
PB: predicated region body
PF: predicated region fallthrough
CT: control target
= control target key end

     0   :  { %8 = vsyncpa [#allocation3], 0  ;;  %s250_s0 = inlined_call_operand.hbm [shape: f32[16,32], index: 0, kind: input, shape index: {}]   ;;  %s251_s1 = inlined_call_operand.hbm [shape: f32[32,48], index: 1, kind: input, shape index: {}]   ;;  %s252_s2 = inlined_call_operand.vmem [shape: f32[1,48], index: 2, kind: input, shape index: {}]   ;;  %s253_s3 = inlined_call_operand.hbm [shape: f32[16,48], index: 3, kind: output, shape index: {}]  }
   0x1   :  { %9 = vsyncpa [#allocation6], 0 }
   0x2   :  { %10 = vsyncpa [#allocation4], 0  ;;  %s15_s14 = sshll.u32 %s250_s0, 4  ;;  %s204_s15 = smov [#allocation2]   ;;  %s16_s14 = int_to_ptr.hbm [resolvable:$true] %s15_s14 }
   0x3   :  { %s17_s16 = sshll.u32 %s204_s15, 4  ;;  %s28_s19 = sshll.u32 %s251_s1, 4  ;;  %s18_s16 = int_to_ptr.vmem [resolvable:$true] %s17_s16  ;;  %s29_s19 = int_to_ptr.hbm [resolvable:$true] %s28_s19 }
   0x4   :  { %s205_s20 = smov 128   ;;  %s206_s21 = smov 8  }
   0x5   :  { %23 = dma.hbm_to_vmem [thread:$0]  %s16_s14, 256, %s18_s16, [#allocation3], %s205_s20, %s205_s20, %s206_s21  }
   0x6   :  { %s207_s22 = smov [#allocation5]  }
   0x7   :  { %s30_s23 = sshll.u32 %s207_s22, 4  ;;  %s31_s23 = int_to_ptr.vmem [resolvable:$true] %s30_s23 }
   0x8   :  { %36 = dma.hbm_to_vmem [thread:$0]  %s29_s19, 512, %s31_s23, [#allocation6], %s205_s20, %s205_s20, %s206_s21  }
   0x9   :  { %198 = dma.done.wait [#allocation3], 256  }
   0xa   :  { %199 = vsyncadd [#allocation3], 4294967040 }
   0xb   :  { %200 = dma.done.wait [#allocation6], 512  }
   0xc   :  { %201 = vsyncadd [#allocation6], 4294966784  ;;  %v52_v0 = vld [vmem:[#allocation5 + $0x18] sm:$0xff]  ;;  %v51_v1 = vld [vmem:[#allocation5 + $0x10] sm:$0xff]  ;;  %vm53_vm0 = vcmask 261120   ;;  %s208_s24 = smov [#allocation7]  }
   0xd   :  { %72 = vmatpush.msra.mxu0 %v52_v0  ;;  %117 = vmatpush.msra.mxu1 %v52_v0  ;;  %v50_v2 = vld [vmem:[#allocation5 + $0x8] sm:$0xff]  ;;  %v49_v3 = vld [vmem:[#allocation5] sm:$0xff]  ;;  %v47_v4 = vld [vmem:[#allocation2] sm:$0xff]  ;;  %s99_s25 = sshll.u32 %s208_s24, 4  ;;  %s101_s28 = sshll.u32 %s253_s3, 4  ;;  %vm92_vm1 = vcmask 392192   ;;  %s100_s25 = int_to_ptr.vmem [resolvable:$true] %s99_s25  ;;  %s102_s28 = int_to_ptr.hbm [resolvable:$true] %s101_s28 }
   0xe   :  { %v48_v5 = vld [vmem:[#allocation2 + $0x8] sm:$0xff]  ;;  %v83_v6 = vld [vmem:[%s252_s2] sm:$0x1] }
   0xf   :  { %73 = vmatpush.msra.mxu0 %v51_v1  ;;  %118 = vmatpush.msra.mxu1 %v51_v1  ;;  %v86_v7 = vmul.f32 0.01, %v83_v6 }
  0x11   :  { %74 = vmatpush.msra.mxu0 %v50_v2  ;;  %119 = vmatpush.msra.mxu1 %v50_v2  ;;  %v88_v8 = vperm.slane %v86_v7, 0 }
  0x13   :  { %75 = vmatpush.msra.mxu0 %v49_v3  ;;  %120 = vmatpush.msra.mxu1 %v49_v3 }
  0x14   :  { %115 = vmatmul.msk.f32.vlgmr.msra.gmra.mxu0 %vm53_vm0, %v47_v4  ;;  %116 = vmatmul.msk.f32.vlgmr.msra.gmra.mxu1 %vm53_vm0, %v48_v5 }
  0x91   :  { %v77_v9 = vpop.f32.mrf.mxu0  ;;  %v80_v10 = vpop.f32.mrf.mxu1 }
  0x92   :  { %v84_v11 = vmul.f32 0.0017677669, %v77_v9  ;;  %v85_v12 = vmul.f32 0.0017677669, %v80_v10 }
  0x94   :  { %v90_v13 = vadd.f32 %v88_v8, %v84_v11  ;;  %v91_v14 = vadd.f32 %v88_v8, %v85_v12 }
  0x96   :  { %93 = vst.msk [vmem:[#allocation7] sm:$0xff] %vm92_vm1, %v90_v13 }
  0x97   :  { %94 = vst.msk [vmem:[#allocation7 + $0x8] sm:$0xff] %vm92_vm1, %v91_v14 }
  0x98   :  { %107 = dma.vmem_to_hbm [thread:$0]  %s100_s25, 256, %s102_s28, [#allocation4], %s205_s20, %s205_s20, %s206_s21  }
  0x99   :  { %202 = dma.done.wait [#allocation4], 256  }
  0x9a   :  { %203 = vsyncadd [#allocation4], 4294967040 }
  0x9b   :  { %112 = vsyncpa [#allocation3], 1 }
  0x9c   :  { %113 = vsyncpa [#allocation6], 1 }
  0x9d   :  { %114 = vsyncpa [#allocation4], 1 }

</bundles_post_ra>
